<compile_context>
chip_gen: v7x
topology: tpu7x:2x2x1
jax: 0.10.0
libtpu: 0.0.40
codegen_flags: <defaults>
</compile_context>

<pallas_src>
import functools

import jax
import jax.numpy as jnp
from jax.experimental import pallas as pl
from jax.experimental.pallas import tpu as pltpu

LANE = 128
SUBLANE = 8
MAX_BLOCK_B = 8192      # VMEM-verified tile cap (safe on v7x's 64 MiB / 32 MiB scoped)
MIN_GRID_STEPS = 4      # v7x has 2 TensorCores; >=4 steps lets "parallel" shard them


def _round_up(n: int, m: int) -> int:
    return (n + m - 1) // m * m


# --------------------------- Mosaic feature probes ---------------------------
# Tiny eager pallas_calls (run once, cached) that detect whether the installed
# Mosaic build supports the two optional optimizations.  Call the public
# wrapper OUTSIDE an enclosing jit so these run eagerly.

@functools.cache
def _supports_col_to_lane_reshape() -> bool:
    """Can Mosaic lower an in-kernel [N,1] -> [N//128,128] reshape?"""
    def k(x_ref, o_ref):
        o_ref[...] = x_ref[...].reshape(8, LANE)
    try:
        x = jnp.arange(1024, dtype=jnp.float32).reshape(1024, 1)
        out = pl.pallas_call(
            k, out_shape=jax.ShapeDtypeStruct((8, LANE), jnp.float32))(x)
        out = jax.block_until_ready(out)
        return bool(jnp.array_equal(out, jnp.arange(1024, dtype=jnp.float32)
                                    .reshape(8, LANE)))
    except Exception:
        return False


@functools.cache
def _supports_single_buffering() -> bool:
    """Is pipeline_mode=pl.Buffered(1) accepted for grid-invariant operands?"""
    def k(x_ref, w_ref, o_ref):
        o_ref[...] = x_ref[...] + w_ref[...]
    try:
        x = jnp.ones((16, LANE), jnp.float32)
        w = jnp.full((8, LANE), 2.0, jnp.float32)
        out = pl.pallas_call(
            k,
            grid=(2,),
            in_specs=[
                pl.BlockSpec((8, LANE), lambda i: (i, 0)),
                pl.BlockSpec((8, LANE), lambda i: (0, 0),
                             pipeline_mode=pl.Buffered(1)),
            ],
            out_specs=pl.BlockSpec((8, LANE), lambda i: (i, 0)),
            out_shape=jax.ShapeDtypeStruct((16, LANE), jnp.float32),
        )(x, w)
        out = jax.block_until_ready(out)
        return bool(jnp.allclose(out, 3.0))
    except Exception:
        return False


# ----------------------------- Pallas kernel --------------------------------

def _mlp_kernel(x_ref, w1_ref, b1_ref, w2_ref, b2_ref, w3_ref, b3_ref, o_ref,
                *, apply_sigmoid: bool, lane_dense: bool):
    """Fused 3-layer MLP on one batch tile.

    x tile arrives as f32 straight from HBM and is cast to bf16 here (VPU op
    with slot slack) — no wrapper-side cast / HBM round-trip.  Matmuls run on
    the MXU with f32 accumulation; bias/ReLU/sigmoid stay f32 (v5e has no bf16
    VPU/EUP path).
    """
    cd = w1_ref.dtype                      # bf16 — MXU-native input dtype
    x = x_ref[...].astype(cd)

    # Each hidden layer's matmul + bias + ReLU + bf16 downcast is a single
    # expression so the f32 intermediate stays in vregs and only the bf16
    # value (at most) touches VMEM — avoids an extra f32 round-trip per layer.
    h = jnp.maximum(
        jnp.dot(x, w1_ref[...], preferred_element_type=jnp.float32) + b1_ref[...],
        0.0).astype(cd)
    h = jnp.maximum(
        jnp.dot(h, w2_ref[...], preferred_element_type=jnp.float32) + b2_ref[...],
        0.0).astype(cd)

    # Output layer: [tb, 1] f32 column.
    y = jnp.dot(h, w3_ref[...], preferred_element_type=jnp.float32)

    if lane_dense:
        # Lane-dense epilogue: one sublane->lane shuffle (XLU / VMEM copy) turns
        # the tb/8 single-lane vregs into tb/1024 fully-populated vregs, so the
        # bias add, sigmoid and store below are dense and the store is an
        # unmasked vst instead of tb/8 masked vst.msk.
        tb = y.shape[0]
        y = y.reshape(tb // LANE, LANE)

    y = y + b3_ref[...]                    # (1,1) bias broadcasts over either layout
    if apply_sigmoid:
        y = jax.nn.sigmoid(y)
    o_ref[...] = y.astype(o_ref.dtype)


# ------------------------------ tile chooser ---------------------------------

def _choose_tile(batch: int, block_b: int):
    """Return (tile_rows, lane_dense)."""
    block_b = max(SUBLANE, min(int(block_b), MAX_BLOCK_B))
    if batch < 1024 or block_b < 1024:
        # Small problems: one (or a few) grid steps; the handful of masked
        # stores on a [tb, 1] output are negligible here.  x is f32 in HBM, so
        # 8-row (f32 sublane) alignment is the natural tile.
        tb = min(_round_up(batch, SUBLANE), _round_up(block_b, SUBLANE))
        return tb, False
    # Large batches: the lane-dense epilogue needs tb % 1024 == 0 so the
    # (tb//128, 128) output block keeps 8-sublane alignment.  Target at least
    # MIN_GRID_STEPS grid steps so both v7x TensorCores get work (no cost on
    # single-TC v5e/v6e beyond a couple of ~0.35 us step overheads).
    block_b = block_b // 1024 * 1024
    target = _round_up(pl.cdiv(batch, MIN_GRID_STEPS), 1024)
    return min(block_b, target), True


# ------------------------------- forward -------------------------------------

@functools.partial(jax.jit,
                   static_argnames=("apply_sigmoid", "tb", "lane_dense",
                                    "single_buffer"))
def _forward(x, packed, *, apply_sigmoid: bool, tb: int, lane_dense: bool,
             single_buffer: bool):
    B, F = x.shape
    out_cols = packed["w3"].shape[1]           # == 1
    H1p = packed["w1"].shape[1]
    H2p = packed["w2"].shape[1]

    grid = (pl.cdiv(B, tb),)                   # ragged last tile: OOB input rows
    nsteps = grid[0]                           # are garbage, their outputs are
                                               # masked/discarded below.

    res_kwargs = {"pipeline_mode": pl.Buffered(1)} if single_buffer else {}

    def resident(shape):
        # Grid-invariant operand: constant index_map keeps it VMEM-resident;
        # Buffered(1) (when supported) drops the useless second buffer.
        return pl.BlockSpec(shape, lambda i: (0, 0), **res_kwargs)

    in_specs = [
        pl.BlockSpec((tb, F), lambda i: (i, 0)),     # x tile (f32, pipelined)
        resident(packed["w1"].shape), resident(packed["b1"].shape),
        resident(packed["w2"].shape), resident(packed["b2"].shape),
        resident(packed["w3"].shape), resident(packed["b3"].shape),
    ]

    if lane_dense:
        rows = tb // LANE
        out_shape = jax.ShapeDtypeStruct((nsteps * rows, LANE), jnp.float32)
        out_specs = pl.BlockSpec((rows, LANE), lambda i: (i, 0))
    else:
        out_shape = jax.ShapeDtypeStruct((B, out_cols), jnp.float32)
        out_specs = pl.BlockSpec((tb, out_cols), lambda i: (i, 0))

    rows_total = nsteps * tb
    cost = pl.CostEstimate(
        flops=2 * rows_total * (F * H1p + H1p * H2p + H2p * out_cols),
        transcendentals=rows_total * out_cols if apply_sigmoid else 0,
        bytes_accessed=(x.size * x.dtype.itemsize
                        + sum(int(v.size) * v.dtype.itemsize
                              for v in packed.values())
                        + rows_total * out_cols * 4),
    )

    kernel = functools.partial(_mlp_kernel, apply_sigmoid=apply_sigmoid,
                               lane_dense=lane_dense)

    y = pl.pallas_call(
        kernel,
        out_shape=out_shape,
        grid=grid,
        in_specs=in_specs,
        out_specs=out_specs,
        compiler_params=pltpu.CompilerParams(
            dimension_semantics=("parallel",)),
        cost_estimate=cost,
    )(x, packed["w1"], packed["b1"], packed["w2"], packed["b2"],
      packed["w3"], packed["b3"])

    if lane_dense:
        # Undo the lane-dense packing (row-major, metadata-only reshape) and
        # drop the padded tail rows of the ragged last tile.
        y = y.reshape(-1, 1)[:B]
    return y


def adaptive_neuralnet_forward(x, packed, *, task_type: str = "regression",
                               block_b: int = MAX_BLOCK_B):
    """Run the fused MLP Pallas kernel.

    x:      [B, input_size] float32 (cast to bf16 inside the kernel)
    packed: dict from pack_params(): bf16 weights stored [in, out], hidden dims
            zero-padded to 128 lanes, f32 biases [1, out_padded].

    Call this outside an enclosing jit (the feature probes run eagerly once).
    """
    B = x.shape[0]
    tb, lane_dense = _choose_tile(B, block_b)
    if lane_dense and not _supports_col_to_lane_reshape():
        lane_dense = False                      # fall back to [tb, 1] column output
    single_buffer = _supports_single_buffering()
    apply_sigmoid = task_type.lower() == "classification"
    return _forward(x, packed, apply_sigmoid=apply_sigmoid, tb=tb,
                    lane_dense=lane_dense, single_buffer=single_buffer)


# --------------------------- parameter setup ---------------------------------

def init_params(key, input_size: int, hidden_layers, output_size: int):
    """Deterministic init matching nn.Linear's U(-1/sqrt(fan_in), 1/sqrt(fan_in)).

    Stored as [in, out] (transpose of PyTorch's [out, in]) so the kernel
    computes y = x @ W + b directly.
    """
    sizes = [input_size] + list(hidden_layers) + [output_size]
    params = {}
    for i, (fin, fout) in enumerate(zip(sizes[:-1], sizes[1:]), start=1):
        key, kw, kb = jax.random.split(key, 3)
        bound = 1.0 / jnp.sqrt(jnp.float32(fin))
        params[f"w{i}"] = jax.random.uniform(kw, (fin, fout), jnp.float32,
                                             minval=-bound, maxval=bound)
        params[f"b{i}"] = jax.random.uniform(kb, (1, fout), jnp.float32,
                                             minval=-bound, maxval=bound)
    return params


def pack_params(params, compute_dtype=jnp.bfloat16):
    """Zero-pad hidden dims to 128 lanes and cast weights to the MXU dtype.

    Padding is exact: padded weight rows/cols are zero and ReLU(0) = 0, so the
    padded lanes carry zeros through the whole network.  Biases stay f32.
    The input feature dim F is intentionally NOT padded (keeps x HBM bytes low;
    the MXU is not the binding unit).
    """
    w1, b1 = params["w1"], params["b1"]
    w2, b2 = params["w2"], params["b2"]
    w3, b3 = params["w3"], params["b3"]
    F, H1 = w1.shape
    H2 = w2.shape[1]
    O = w3.shape[1]
    H1p = _round_up(H1, LANE)
    H2p = _round_up(H2, LANE)

    w1p = jnp.zeros((F, H1p), compute_dtype).at[:, :H1].set(w1.astype(compute_dtype))
    b1p = jnp.zeros((1, H1p), jnp.float32).at[:, :H1].set(b1)
    w2p = jnp.zeros((H1p, H2p), compute_dtype).at[:H1, :H2].set(w2.astype(compute_dtype))
    b2p = jnp.zeros((1, H2p), jnp.float32).at[:, :H2].set(b2)
    w3p = jnp.zeros((H2p, O), compute_dtype).at[:H2, :].set(w3.astype(compute_dtype))
    b3p = b3.astype(jnp.float32)
    return dict(w1=w1p, b1=b1p, w2=w2p, b2=b2p, w3=w3p, b3=b3p)


# ------------------------------ references -----------------------------------

def reference_forward_f32(x, params, *, task_type="regression"):
    """Pure-f32 reference matching the PyTorch module's math."""
    h = jnp.maximum(x @ params["w1"] + params["b1"], 0.0)
    h = jnp.maximum(h @ params["w2"] + params["b2"], 0.0)
    y = h @ params["w3"] + params["b3"]
    if task_type.lower() == "classification":
        y = jax.nn.sigmoid(y)
    return y


def reference_forward_bf16(x, packed, *, task_type="regression"):
    """Reference mirroring the kernel's dtype choices (bf16 MXU, f32 accum)."""
    cd = packed["w1"].dtype
    h = jnp.dot(x.astype(cd), packed["w1"], preferred_element_type=jnp.float32)
    h = jnp.maximum(h + packed["b1"], 0.0)
    h = jnp.dot(h.astype(cd), packed["w2"], preferred_element_type=jnp.float32)
    h = jnp.maximum(h + packed["b2"], 0.0)
    y = jnp.dot(h.astype(cd), packed["w3"], preferred_element_type=jnp.float32)
    y = y + packed["b3"]
    if task_type.lower() == "classification":
        y = jax.nn.sigmoid(y)
    return y


# --------------------------------- main ---------------------------------------

if __name__ == "__main__":
    key = jax.random.PRNGKey(0)
    kx, kx2, kp = jax.random.split(key, 3)

    input_size = 32
    hidden_layers = [64, 32]
    output_size = 1

    params = init_params(kp, input_size, hidden_layers, output_size)
    packed = pack_params(params)

    # --- small batch: single grid step, column epilogue ---
    batch = 8
    x = jax.random.normal(kx, (batch, input_size), jnp.float32)

    out = jax.block_until_ready(
        adaptive_neuralnet_forward(x, packed, task_type="regression"))
    assert out.shape == (batch, output_size)
    ref_bf16 = reference_forward_bf16(x, packed, task_type="regression")
    ref_f32 = reference_forward_f32(x, params, task_type="regression")
    assert jnp.allclose(out, ref_bf16, atol=2e-3, rtol=2e-3), "mismatch vs bf16 ref"
    assert jnp.allclose(out, ref_f32, atol=5e-2, rtol=5e-2), "mismatch vs f32 ref"

    out_c = jax.block_until_ready(
        adaptive_neuralnet_forward(x, packed, task_type="classification"))
    ref_c = reference_forward_bf16(x, packed, task_type="classification")
    assert jnp.allclose(out_c, ref_c, atol=2e-3, rtol=2e-3), "mismatch (classification)"
    assert bool(jnp.all((out_c > 0.0) & (out_c < 1.0)))

    # --- larger ragged batch: multi-step grid, lane-dense epilogue (if supported),
    #     ragged last tile handled by masking/slicing instead of padding ---
    batch_big = 2500                      # not a multiple of the 1024-row tile
    x_big = jax.random.normal(kx2, (batch_big, input_size), jnp.float32)
    out_big = jax.block_until_ready(
        adaptive_neuralnet_forward(x_big, packed, task_type="regression"))
    assert out_big.shape == (batch_big, output_size)
    ref_big = reference_forward_bf16(x_big, packed, task_type="regression")
    assert jnp.allclose(out_big, ref_big, atol=2e-3, rtol=2e-3), "mismatch (large B)"

    print("KERNEL_OK")
</pallas_src>

<mosaic_0001>
module attributes {stable_mosaic.version = 11 : i64} {
  func.func @k(%arg0: i32, %arg1: memref<8x128xf32, #tpu.memory_space<vmem>>, %arg2: memref<8x128xf32, #tpu.memory_space<vmem>>, %arg3: memref<8x128xf32, #tpu.memory_space<vmem>>) attributes {dimension_semantics = [#tpu.dimension_semantics<arbitrary>], iteration_bounds = array<i64: 2>, scalar_prefetch = 0 : i64, scratch_operands = 0 : i64, tpu.core_type = #tpu.core_type<tc>, window_params = [{transform_indices = @transform_0, window_bounds = array<i64: 8, 128>}, {pipeline_mode = #tpu.pipeline_mode<synchronous>, transform_indices = @transform_1, window_bounds = array<i64: 8, 128>}, {transform_indices = @transform_2, window_bounds = array<i64: 8, 128>}]} {
    %c0 = arith.constant 0 : index
    %c0_0 = arith.constant 0 : index
    %0 = vector.load %arg1[%c0, %c0_0] : memref<8x128xf32, #tpu.memory_space<vmem>>, vector<8x128xf32>
    %c0_1 = arith.constant 0 : index
    %c0_2 = arith.constant 0 : index
    %1 = vector.load %arg2[%c0_1, %c0_2] : memref<8x128xf32, #tpu.memory_space<vmem>>, vector<8x128xf32>
    %2 = arith.addf %0, %1 : vector<8x128xf32>
    %c0_3 = arith.constant 0 : index
    %c0_4 = arith.constant 0 : index
    %3 = vector.load %arg3[%c0_3, %c0_4] : memref<8x128xf32, #tpu.memory_space<vmem>>, vector<8x128xf32>
    tpu.vector_store %arg3[%c0_3, %c0_4], %2 {strides = array<i32>} : memref<8x128xf32, #tpu.memory_space<vmem>>, vector<8x128xf32>,
    return
  }
  func.func @transform_0(%arg0: i32) -> (i32, i32) {
    %c0_i32 = arith.constant 0 : i32
    %c0_i32_0 = arith.constant 0 : i32
    return %arg0, %c0_i32 : i32, i32
  }
  func.func @transform_1(%arg0: i32) -> (i32, i32) {
    %c0_i32 = arith.constant 0 : i32
    %c0_i32_0 = arith.constant 0 : i32
    %c0_i32_1 = arith.constant 0 : i32
    return %c0_i32, %c0_i32_0 : i32, i32
  }
  func.func @transform_2(%arg0: i32) -> (i32, i32) {
    %c0_i32 = arith.constant 0 : i32
    %c0_i32_0 = arith.constant 0 : i32
    return %arg0, %c0_i32 : i32, i32
  }
}

module attributes {stable_mosaic.version = 11 : i64} {
  func.func @_mlp_kernel(%arg0: i32, %arg1: memref<8x32xf32, #tpu.memory_space<vmem>>, %arg2: memref<32x128xbf16, #tpu.memory_space<vmem>>, %arg3: memref<1x128xf32, #tpu.memory_space<vmem>>, %arg4: memref<128x128xbf16, #tpu.memory_space<vmem>>, %arg5: memref<1x128xf32, #tpu.memory_space<vmem>>, %arg6: memref<128x1xbf16, #tpu.memory_space<vmem>>, %arg7: memref<1x1xf32, #tpu.memory_space<vmem>>, %arg8: memref<8x1xf32, #tpu.memory_space<vmem>>) attributes {dimension_semantics = [#tpu.dimension_semantics<parallel>], iteration_bounds = array<i64: 1>, scalar_prefetch = 0 : i64, scratch_operands = 0 : i64, tpu.core_type = #tpu.core_type<tc>, window_params = [{transform_indices = @transform_0, window_bounds = array<i64: 8, 32>}, {pipeline_mode = #tpu.pipeline_mode<synchronous>, transform_indices = @transform_1, window_bounds = array<i64: 32, 128>}, {pipeline_mode = #tpu.pipeline_mode<synchronous>, transform_indices = @transform_2, window_bounds = array<i64: 1, 128>}, {pipeline_mode = #tpu.pipeline_mode<synchronous>, transform_indices = @transform_3, window_bounds = array<i64: 128, 128>}, {pipeline_mode = #tpu.pipeline_mode<synchronous>, transform_indices = @transform_4, window_bounds = array<i64: 1, 128>}, {pipeline_mode = #tpu.pipeline_mode<synchronous>, transform_indices = @transform_5, window_bounds = array<i64: 128, 1>}, {pipeline_mode = #tpu.pipeline_mode<synchronous>, transform_indices = @transform_6, window_bounds = array<i64: 1, 1>}, {transform_indices = @transform_7, window_bounds = array<i64: 8, 1>}]} {
    %c0 = arith.constant 0 : index
    %c0_0 = arith.constant 0 : index
    %0 = vector.load %arg1[%c0, %c0_0] : memref<8x32xf32, #tpu.memory_space<vmem>>, vector<8x32xf32>
    %1 = arith.truncf %0 : vector<8x32xf32> to vector<8x32xbf16>
    %c0_1 = arith.constant 0 : index
    %c0_2 = arith.constant 0 : index
    %2 = vector.load %arg2[%c0_1, %c0_2] : memref<32x128xbf16, #tpu.memory_space<vmem>>, vector<32x128xbf16>
    %cst = arith.constant dense<0.000000e+00> : vector<8x128xf32>
    %3 = tpu.matmul %1, %2, %cst {dimension_numbers = #tpu.dot_dimension_numbers<[1], [0], [0], [1], [0, 0, 1, 1], [], []>} : vector<8x32xbf16>, vector<32x128xbf16>, vector<8x128xf32> -> vector<8x128xf32>
    %c0_3 = arith.constant 0 : index
    %c0_4 = arith.constant 0 : index
    %4 = vector.load %arg3[%c0_3, %c0_4] : memref<1x128xf32, #tpu.memory_space<vmem>>, vector<1x128xf32>
    %5 = vector.broadcast %4 : vector<1x128xf32> to vector<8x128xf32>
    %6 = arith.addf %3, %5 : vector<8x128xf32>
    %cst_5 = arith.constant 0.000000e+00 : f32
    %7 = vector.broadcast %cst_5 : f32 to vector<8x128xf32>
    %8 = arith.maximumf %6, %7 : vector<8x128xf32>
    %9 = arith.truncf %8 : vector<8x128xf32> to vector<8x128xbf16>
    %c0_6 = arith.constant 0 : index
    %c0_7 = arith.constant 0 : index
    %10 = vector.load %arg4[%c0_6, %c0_7] : memref<128x128xbf16, #tpu.memory_space<vmem>>, vector<128x128xbf16>
    %cst_8 = arith.constant dense<0.000000e+00> : vector<8x128xf32>
    %11 = tpu.matmul %9, %10, %cst_8 {dimension_numbers = #tpu.dot_dimension_numbers<[1], [0], [0], [1], [0, 0, 1, 1], [], []>} : vector<8x128xbf16>, vector<128x128xbf16>, vector<8x128xf32> -> vector<8x128xf32>
    %c0_9 = arith.constant 0 : index
    %c0_10 = arith.constant 0 : index
    %12 = vector.load %arg5[%c0_9, %c0_10] : memref<1x128xf32, #tpu.memory_space<vmem>>, vector<1x128xf32>
    %13 = vector.broadcast %12 : vector<1x128xf32> to vector<8x128xf32>
    %14 = arith.addf %11, %13 : vector<8x128xf32>
    %cst_11 = arith.constant 0.000000e+00 : f32
    %15 = vector.broadcast %cst_11 : f32 to vector<8x128xf32>
    %16 = arith.maximumf %14, %15 : vector<8x128xf32>
    %17 = arith.truncf %16 : vector<8x128xf32> to vector<8x128xbf16>
    %c0_12 = arith.constant 0 : index
    %c0_13 = arith.constant 0 : index
    %18 = vector.load %arg6[%c0_12, %c0_13] : memref<128x1xbf16, #tpu.memory_space<vmem>>, vector<128x1xbf16>
    %cst_14 = arith.constant dense<0.000000e+00> : vector<8x1xf32>
    %19 = tpu.matmul %17, %18, %cst_14 {dimension_numbers = #tpu.dot_dimension_numbers<[1], [0], [0], [1], [0, 0, 1, 1], [], []>} : vector<8x128xbf16>, vector<128x1xbf16>, vector<8x1xf32> -> vector<8x1xf32>
    %c0_15 = arith.constant 0 : index
    %c0_16 = arith.constant 0 : index
    %20 = vector.load %arg7[%c0_15, %c0_16] : memref<1x1xf32, #tpu.memory_space<vmem>>, vector<1x1xf32>
    %21 = vector.broadcast %20 : vector<1x1xf32> to vector<8x1xf32>
    %22 = arith.addf %19, %21 : vector<8x1xf32>
    %c0_17 = arith.constant 0 : index
    %c0_18 = arith.constant 0 : index
    %23 = vector.load %arg8[%c0_17, %c0_18] : memref<8x1xf32, #tpu.memory_space<vmem>>, vector<8x1xf32>
    tpu.vector_store %arg8[%c0_17, %c0_18], %22 {strides = array<i32>} : memref<8x1xf32, #tpu.memory_space<vmem>>, vector<8x1xf32>,
    return
  }
  func.func @transform_0(%arg0: i32) -> (i32, i32) {
    %c0_i32 = arith.constant 0 : i32
    %c0_i32_0 = arith.constant 0 : i32
    return %arg0, %c0_i32 : i32, i32
  }
  func.func @transform_1(%arg0: i32) -> (i32, i32) {
    %c0_i32 = arith.constant 0 : i32
    %c0_i32_0 = arith.constant 0 : i32
    %c0_i32_1 = arith.constant 0 : i32
    return %c0_i32, %c0_i32_0 : i32, i32
  }
  func.func @transform_2(%arg0: i32) -> (i32, i32) {
    %c0_i32 = arith.constant 0 : i32
    %c0_i32_0 = arith.constant 0 : i32
    %c0_i32_1 = arith.constant 0 : i32
    return %c0_i32, %c0_i32_0 : i32, i32
  }
  func.func @transform_3(%arg0: i32) -> (i32, i32) {
    %c0_i32 = arith.constant 0 : i32
    %c0_i32_0 = arith.constant 0 : i32
    %c0_i32_1 = arith.constant 0 : i32
    return %c0_i32, %c0_i32_0 : i32, i32
  }
  func.func @transform_4(%arg0: i32) -> (i32, i32) {
    %c0_i32 = arith.constant 0 : i32
    %c0_i32_0 = arith.constant 0 : i32
    %c0_i32_1 = arith.constant 0 : i32
    return %c0_i32, %c0_i32_0 : i32, i32
  }
  func.func @transform_5(%arg0: i32) -> (i32, i32) {
    %c0_i32 = arith.constant 0 : i32
    %c0_i32_0 = arith.constant 0 : i32
    %c0_i32_1 = arith.constant 0 : i32
    return %c0_i32, %c0_i32_0 : i32, i32
  }
  func.func @transform_6(%arg0: i32) -> (i32, i32) {
    %c0_i32 = arith.constant 0 : i32
    %c0_i32_0 = arith.constant 0 : i32
    %c0_i32_1 = arith.constant 0 : i32
    return %c0_i32, %c0_i32_0 : i32, i32
  }
  func.func @transform_7(%arg0: i32) -> (i32, i32) {
    %c0_i32 = arith.constant 0 : i32
    %c0_i32_0 = arith.constant 0 : i32
    return %arg0, %c0_i32 : i32, i32
  }
}

</mosaic_0001>

<bundles_post_ra>
// kernel: tpu_custom_call.1
= control target key start
LH: loop header
LB: loop body
LE: loop exit
PB: predicated region body
PF: predicated region fallthrough
CT: control target
= control target key end

     0   :  { %7 = vsyncpa [#allocation3], 0  ;;  %s690_s0 = inlined_call_operand.hbm [shape: f32[16,128], index: 0, kind: input, shape index: {}]   ;;  %s691_s1 = inlined_call_operand.hbm [shape: f32[8,128], index: 1, kind: input, shape index: {}]   ;;  %s692_s2 = inlined_call_operand.hbm [shape: f32[16,128], index: 2, kind: output, shape index: {}]  }
   0x1   :  { %9 = vsyncpa [#allocation3 + $0x1], 0 }
   0x2   :  { %10 = vsyncpa [#allocation6], 0 }
   0x3   :  { %11 = vsyncpa [#allocation4], 0 }
   0x4   :  { %13 = vsyncpa [#allocation4 + $0x1], 0  ;;  %s489_s9 = smov 0   ;;  %s491_s10 = smov 0  }
   0x5   :  { %s493_s11 = smov 0   ;;  %s495_s12 = smov 0  }
   0x6 LB: > { %s510_s13 = sadd.s32 4294967295, %s469_s12   ;;  %s270_s14 = sadd.s32 4294967294, %s469_s12   ;;  %s469_s12 = sphi %s495_s12, %s716_s12   ;;  %s465_s11 = sphi %s493_s11, %s715_s11   ;;  %s461_s10 = sphi %s491_s10, %s714_s10   ;;  %s457_s9 = sphi %s489_s9, %s713_s9  }
   0x7   : > { %p39_p0 = scmp.ne.s32.totalorder %s461_s10, %s457_s9  ;;  %p693_p1 = scmp.eq.s32.totalorder %s510_s13, 0 }
   0x8   : > { %p90_p3 = scmp.eq.s32.totalorder %s270_s14, 1  ;;  %p271_p5 = scmp.ge.s32.totalorder %s469_s12, 1 }
   0x9   : > { %p519_p4 = por %p693_p1, %p39_p0  ;;  %p97_p7 = scmp.lt.s32.totalorder %s469_s12, 3 }
   0xa   : > { %p524_p6 = por %p90_p3, %p39_p0  ;;  %s471_s18 = smov [#allocation5]  }
   0xb   : > { %s696_s15 = scalar_select %p519_p4, 1, 0 }
   0xc   : > { %s697_s16 = scalar_select %p524_p6, 1, 0 }
   0xd   : > { %p529_p8 = pnand %p271_p5, %p97_p7  ;;  %s110_s19 = sshll.u32 %s471_s18, 4  ;;  %s111_s19 = int_to_ptr.vmem [resolvable:$true] %s110_s19 }
   0xe   : > { %s537_s20 = sadd.s32 1, %s469_s12   ;;  %s26_s24 = sadd.s32 1, %s465_s11 }
   0xf   : > { %s698_s17 = scalar_select %p529_p8, 1, 0 }
  0x10   : > { %p292_p10 = pneg %p529_p8  ;;  %s23_s22 = ssub.s32 %s469_s12, %s537_s20 }
  0x11   : > { %p547_p12 = scmp.eq.s32.totalorder %s23_s22, 0  ;;  %s341_s27 = scalar_lea.hbm %s691_s1, 128 }
  0x12   : > { %p541_p11 = pnand %p292_p10, %p693_p1  ;;  %p342_p0 = scmp.ne.s32.totalorder %s691_s1, %s341_s27 }
  0x13   : > { %s700_s23 = scalar_select %p547_p12, 1, 0 }
  0x14   : > { %p343_p3 = pneg %p541_p11  ;;  %p348_p10 = scmp.lt.u32.totalorder %s341_s27, %s691_s1 }
  0x16   : > { %p344_p5 = pnand %p343_p3, %p342_p0 }
  0x18   : > { %p345_p7 = pneg %p344_p5 }
  0x1a   : > { %p350_p9 = pnand %p348_p10, %p345_p7 }
  0x1c   : > { %353 = shalt.err (!%p350_p9)
}
  0x1d   : > { %s354_s4 = scalar_lea.vmem %s111_s19, 128  ;;  %p362_p6 = scmp.lt.s32.totalorder %s111_s19, %s111_s19 }
  0x1e   : > { %p355_p1 = scmp.ne.s32.totalorder %s111_s19, %s354_s4  ;;  %p363_p4 = scmp.lt.s32.totalorder %s354_s4, %s354_s4 }
  0x20   : > { %p357_p2 = pnand %p355_p1, %p343_p3  ;;  %p364_p8 = por %p363_p4, %p362_p6 }
  0x22   : > { %p358_p13 = pneg %p357_p2 }
  0x24   : > { %p365_p12 = pnand %p364_p8, %p358_p13 }
  0x26   : > { %368 = shalt.err (!%p365_p12)
}
  0x27   : > { %295 = dma.hbm_to_vmem [thread:$0]  (!%p541_p11), %s691_s1, 128, %s111_s19, [#allocation6]  }
  0x28   : > { %p701_p1 = scmp.ne.s32.totalorder %s700_s23, 0  ;;  %p34_p2 = scmp.eq.s32.totalorder %s469_s12, 0 }
  0x29   : > { %p702_p4 = scmp.ne.s32.totalorder %s465_s11, %s461_s10  ;;  %p703_p6 = scmp.eq.s32.totalorder %s510_s13, 1 }
  0x2a   : > { %s573_s7 = scalar_select %p701_p1, %s465_s11, %s26_s24  }
  0x2b   : > { %p581_p8 = por %p703_p6, %p702_p4  ;;  %p305_p9 = scmp.lt.s32.totalorder %s469_s12, 2 }
  0x2c   : > { %s121_s14 = sand.u32 1, %s465_s11   ;;  %p705_p12 = pmov %p702_p4 }
  0x2d   : > { %s274_s18 = sshll.u32 %s121_s14, 3  ;;  %s275_s21 = sshll.u32 %s469_s12, 7 }
  0x2e   : > { %p35_p13 = por %p34_p2, %p705_p12  ;;  %s594_s19 = scalar_lea.hbm %s690_s0, %s275_s21 }
  0x2f   : > { %s125_s23 = scalar_lea.vmem [#allocation2], %s274_s18  ;;  %s122_s27 = scalar_lea.sflag [#allocation3], %s121_s14 }
  0x30   : > { %s132_s24 = sshll.u32 %s125_s23, 4  ;;  %p596_p11 = pnand %p305_p9, %p35_p13  ;;  %s600_s24 = int_to_ptr.vmem [resolvable:$true] %s132_s24 }
  0x31   : > { %s369_s28 = scalar_lea.hbm %s594_s19, 128  ;;  %s374_s3 = scalar_lea.hbm %s690_s0, 256 }
  0x32   : > { %p370_p0 = scmp.ne.s32.totalorder %s594_s19, %s369_s28  ;;  %p371_p3 = pneg %p596_p11 }
  0x33   : > { %p375_p10 = scmp.lt.u32.totalorder %s594_s19, %s690_s0  ;;  %p376_p1 = scmp.lt.u32.totalorder %s374_s3, %s369_s28 }
  0x34   : > { %p372_p5 = pnand %p371_p3, %p370_p0  ;;  %p378_p4 = scmp.lt.u32.totalorder %s369_s28, %s594_s19 }
  0x35   : > { %p377_p2 = por %p376_p1, %p375_p10 }
  0x36   : > { %p373_p7 = pneg %p372_p5 }
  0x37   : > { %p379_p6 = por %p378_p4, %p377_p2 }
  0x39   : > { %p380_p9 = pnand %p379_p6, %p373_p7 }
  0x3b   : > { %383 = shalt.err (!%p380_p9)
}
  0x3c   : > { %s384_s6 = scalar_lea.vmem %s600_s24, 128  ;;  %s472_s14 = smov [#allocation2]  }
  0x3d   : > { %p385_p12 = scmp.ne.s32.totalorder %s600_s24, %s384_s6  ;;  %s389_s18 = sshll.u32 %s472_s14, 4  ;;  %s390_s18 = int_to_ptr.vmem [resolvable:$false] %s389_s18 }
  0x3e   : > { %s391_s21 = scalar_lea.vmem %s390_s18, 256  ;;  %p392_p5 = scmp.lt.s32.totalorder %s600_s24, %s390_s18 }
  0x3f   : > { %p387_p13 = pnand %p385_p12, %p371_p3  ;;  %p393_p10 = scmp.lt.s32.totalorder %s391_s21, %s384_s6 }
  0x41   : > { %p388_p0 = pneg %p387_p13  ;;  %p394_p1 = por %p393_p10, %p392_p5 }
  0x43   : > { %p395_p2 = pnand %p394_p1, %p388_p0 }
  0x45   : > { %398 = shalt.err (!%p395_p2)
}
  0x46   : > { %299 = dma.hbm_to_vmem [thread:$0]  (!%p596_p11), %s594_s19, 128, %s600_s24, %s122_s27  }
  0x47   : > { %p707_p7 = scmp.ne.s32.totalorder %s698_s17, 0 }
  0x48   : > { %s630_s22 = sand.u32 (!%p707_p7), 1, %s461_s10   ;;  %p708_p3 = scmp.ne.s32.totalorder (!%p707_p7), %s696_s15, 0 }
  0x49   : > { %141 = sbr.rel (%p707_p7) target bundleno = 109 (0x6d), region = 28  ;;  %s277_s25 = sshll.u32 (!%p707_p7), %s630_s22, 3 }
  0x4a   : > { %s144_s23 = scalar_lea.sflag (!%p707_p7), [#allocation3], %s630_s22  ;;  %s147_s28 = scalar_lea.vmem (!%p707_p7), [#allocation2], %s277_s25 }
  0x50   : > { %444 = dma.done.wait (%p708_p3), %s144_s23, 128  }
  0x51   : > { %446 = vsyncadd (%p708_p3), %s144_s23, 4294967168  ;;  %p709_p4 = scmp.eq.s32.totalorder %s510_s13, 0 }
  0x53   : > { %448 = dma.done.wait (%p709_p4), [#allocation6], 128   ;;  %p710_p11 = pmov %p709_p4 }
  0x54   : > { %s171_s17 = scalar_lea.vmem [#allocation7], %s277_s25  ;;  %s281_s24 = sshll.u32 %s510_s13, 7  ;;  %v172_v0 = vld [vmem:[%s147_s28] sm:$0xff]  ;;  %v173_v1 = vld [vmem:[#allocation5] sm:$0xff] }
  0x55   : > { %450 = vsyncadd (%p710_p11), [#allocation6], 4294967168  ;;  %s190_s19 = sshll.u32 %s171_s17, 4  ;;  %v174_v2 = vadd.f32 %v173_v1, %v172_v0  ;;  %s648_s27 = scalar_lea.hbm %s692_s2, %s281_s24  ;;  %s643_s19 = int_to_ptr.vmem [resolvable:$true] %s190_s19 }
  0x56   : > { %s177_s29 = scalar_lea.sflag [#allocation4], %s630_s22  ;;  %s399_s30 = scalar_lea.vmem %s643_s19, 128 }
  0x57   : > { %175 = vst [vmem:[%s171_s17] sm:$0xff] %v174_v2  ;;  %p400_p6 = scmp.ne.s32.totalorder %s643_s19, %s399_s30  ;;  %s473_s13 = smov [#allocation7]  }
  0x58   : > { %s403_s3 = sshll.u32 %s473_s13, 4  ;;  %s404_s3 = int_to_ptr.vmem [resolvable:$false] %s403_s3 }
  0x59   : > { %p401_p9 = pnand %p400_p6, %p581_p8  ;;  %s405_s4 = scalar_lea.vmem %s404_s3, 256 }
  0x5a   : > { %p406_p13 = scmp.lt.s32.totalorder %s643_s19, %s404_s3  ;;  %p407_p0 = scmp.lt.s32.totalorder %s405_s4, %s399_s30 }
  0x5b   : > { %p402_p12 = pneg %p401_p9 }
  0x5c   : > { %p408_p5 = por %p407_p0, %p406_p13 }
  0x5e   : > { %p409_p10 = pnand %p408_p5, %p402_p12 }
  0x60   : > { %412 = shalt.err (!%p409_p10)
}
  0x61   : > { %s413_s5 = scalar_lea.hbm %s648_s27, 128  ;;  %s417_s18 = scalar_lea.hbm %s692_s2, 256 }
  0x62   : > { %p414_p1 = scmp.ne.s32.totalorder %s648_s27, %s413_s5  ;;  %p418_p3 = scmp.lt.u32.totalorder %s648_s27, %s692_s2 }
  0x63   : > { %p419_p4 = scmp.lt.u32.totalorder %s417_s18, %s413_s5  ;;  %p421_p6 = scmp.lt.u32.totalorder %s413_s5, %s648_s27 }
  0x64   : > { %p415_p2 = pnand %p414_p1, %p581_p8 }
  0x65   : > { %p420_p11 = por %p419_p4, %p418_p3 }
  0x66   : > { %p416_p7 = pneg %p415_p2 }
  0x67   : > { %p422_p9 = por %p421_p6, %p420_p11 }
  0x69   : > { %p423_p12 = pnand %p422_p9, %p416_p7 }
  0x6b   : > { %426 = shalt.err (!%p423_p12)
}
  0x6c   : > { %290 = dma.vmem_to_hbm [thread:$0]  (%p581_p8), %s643_s19, 128, %s648_s27, %s177_s29  }
  0x6d PF: > { %s202_s25 = sand.u32 1, %s457_s9   ;;  %p711_p13 = scmp.ne.s32.totalorder %s697_s16, 0 }
  0x6e   : > { %p712_p0 = scmp.ge.s32.totalorder %s469_s12, 2  ;;  %s203_s23 = scalar_lea.sflag [#allocation4], %s202_s25 }
  0x70   : > { %p301_p5 = pnand %p712_p0, %p711_p13 }
  0x72   : > { %452 = dma.done.wait (!%p301_p5), %s203_s23, 128  }
  0x73   : > { %454 = vsyncadd (!%p301_p5), %s203_s23, 4294967168  ;;  %p16_p10 = scmp.ge.s32.totalorder %s537_s20, 4   ;;  %s713_s9 = smov %s461_s10 }
  0x74   : > { %s714_s10 = smov %s465_s11  ;;  %s715_s11 = smov %s573_s7 }
  0x75   : > { %s716_s12 = smov %s537_s20  ;;  %18 = sbr.rel (!%p16_p10) target bundleno = 6 (0x6), region = 77 }
  0x7c   :  { %208 = vsyncpa [#allocation3], 1 }
  0x7d   :  { %210 = vsyncpa [#allocation3 + $0x1], 1 }
  0x7e   :  { %211 = vsyncpa [#allocation6], 1 }
  0x7f   :  { %212 = vsyncpa [#allocation4], 1 }
  0x80   :  { %214 = vsyncpa [#allocation4 + $0x1], 1 }

// kernel: _forward.1
= control target key start
LH: loop header
LB: loop body
LE: loop exit
PB: predicated region body
PF: predicated region fallthrough
CT: control target
= control target key end

     0   :  { %s624_s0 = inlined_call_operand.hbm [shape: f32[8,32], index: 0, kind: input, shape index: {}]   ;;  %s625_s1 = inlined_call_operand.vmem [shape: bf16[32,128], index: 1, kind: input, shape index: {}]   ;;  %s626_s2 = inlined_call_operand.vmem [shape: f32[1,128], index: 2, kind: input, shape index: {}]   ;;  %s627_s3 = inlined_call_operand.vmem [shape: bf16[128,128], index: 3, kind: input, shape index: {}]   ;;  %s628_s4 = inlined_call_operand.vmem [shape: f32[1,128], index: 4, kind: input, shape index: {}]   ;;  %s629_s5 = inlined_call_operand.vmem [shape: bf16[128,1], index: 5, kind: input, shape index: {}]   ;;  %s630_s6 = inlined_call_operand.<no memory space> [shape: f32[1,1], index: 6, kind: input, shape index: {}]   ;;  %s631_s7 = inlined_call_operand.vmem [shape: f32[8,1], index: 7, kind: output, shape index: {}]  }
   0x1   :  { %v12_v0 = vstv %s630_s6 }
   0x2   :  { %13 = vst [vmem:[#allocation2] sm:$0x1] %v12_v0 }
   0x3   :  { %14 = vsyncpa [#allocation4], 0  ;;  %s479_s26 = smov [#allocation3]   ;;  %s455_s30 = scalar_lea.hbm %s624_s0, 128 }
   0x4   :  { %s21_s27 = sshll.u32 %s479_s26, 4  ;;  %p456_p0 = scmp.ne.s32.totalorder %s624_s0, %s455_s30  ;;  %s22_s27 = int_to_ptr.vmem [resolvable:$true] %s21_s27 }
   0x5   :  { %p459_p1 = scmp.lt.u32.totalorder %s455_s30, %s624_s0 }
   0x7   :  { %p461_p2 = pnand %p459_p1, %p456_p0 }
   0x9   :  { %464 = shalt.err (!%p461_p2)
}
   0xa   :  { %s465_s6 = scalar_lea.vmem %s22_s27, 128  ;;  %p470_p4 = scmp.lt.s32.totalorder %s22_s27, %s22_s27 }
   0xb   :  { %p466_p3 = scmp.ne.s32.totalorder %s22_s27, %s465_s6  ;;  %p471_p5 = scmp.lt.s32.totalorder %s465_s6, %s465_s6 }
   0xd   :  { %p472_p6 = por %p471_p5, %p470_p4 }
   0xf   :  { %p473_p7 = pnand %p472_p6, %p466_p3 }
  0x11   :  { %476 = shalt.err (!%p473_p7)
}
  0x12   :  { %24 = dma.hbm_to_vmem [thread:$0]  %s624_s0, 128, %s22_s27, [#allocation4]  }
  0x13   :  { %477 = dma.done.wait [#allocation4], 128  }
  0x14   :  { %478 = vsyncadd [#allocation4], 4294967168  ;;  %v480_v1 = vmov 0.0   ;;  %vm481_vm0 = vmmov 0   ;;  %v437_v2 = vld [vmem:[%s625_s1] sm:$0xff]   ;;  %v438_v3 = vld [vmem:[%s625_s1 + $0x8] sm:$0xff]  }
  0x15   :  { %386 = vmatprep.subr.bf16.mxu0 %v480_v1  ;;  %390 = vmatprep.mubr.msk.bf16.mxu0 %vm481_vm0, %v480_v1  ;;  %v41_v4 = vld [vmem:[#allocation3] sm:$0xff]  ;;  %vm66_vm1 = vcmask 261120   ;;  %v441_v8 = vld [vmem:[%s627_s3 + $0x10] sm:$0xff]   ;;  %v442_v9 = vld [vmem:[%s627_s3 + $0x18] sm:$0xff]   ;;  %vm336_vm2 = vcmask 7168  }
  0x16   :  { %394 = vmatprep.subr.bf16.mxu1 %v480_v1  ;;  %410 = vmatprep.mubr.msk.bf16.mxu1 %vm481_vm0, %v480_v1  ;;  %v439_v5 = vld [vmem:[%s627_s3] sm:$0xff]   ;;  %v42_v6 = vpack.c.bf16 %v41_v4, %v41_v4  ;;  %v440_v7 = vld [vmem:[%s627_s3 + $0x8] sm:$0xff]   ;;  %v445_v12 = vld [vmem:[%s627_s3 + $0x30] sm:$0xff]  }
  0x17   :  { %387 = vmatpush3.bf16.msra.mxu0 %v437_v2  ;;  %395 = vmatpush3.bf16.msra.mxu1 %v439_v5  ;;  %v443_v10 = vld [vmem:[%s627_s3 + $0x20] sm:$0xff]   ;;  %v444_v11 = vld [vmem:[%s627_s3 + $0x28] sm:$0xff]   ;;  %v446_v13 = vld [vmem:[%s627_s3 + $0x38] sm:$0xff]  }
  0x18   :  { %388 = vmatprep.subr.bf16.mxu0 %v480_v1  ;;  %396 = vmatprep.subr.bf16.mxu1 %v480_v1  ;;  %v447_v14 = vld [vmem:[%s629_s5] sm:$0xff]   ;;  %v448_v15 = vld [vmem:[%s629_s5 + $0x8] sm:$0xff]   ;;  %v449_v16 = vld [vmem:[%s629_s5 + $0x10] sm:$0xff]  }
  0x19   :  { %v450_v17 = vld [vmem:[%s629_s5 + $0x18] sm:$0xff]   ;;  %v451_v18 = vld [vmem:[%s629_s5 + $0x20] sm:$0xff]   ;;  %v452_v19 = vld [vmem:[%s629_s5 + $0x28] sm:$0xff]  }
  0x1a   :  { %v343_v20 = vld [vmem:[%s626_s2] ss:$0 sm:$0xff]  ;;  %v453_v28 = vld [vmem:[%s629_s5 + $0x30] sm:$0xff]   ;;  %v454_v29 = vld [vmem:[%s629_s5 + $0x38] sm:$0xff]  }
  0x1b   :  { %389 = vmatpush3.bf16.msra.mxu0 %v438_v3  ;;  %397 = vmatpush3.bf16.msra.mxu1 %v440_v7  ;;  %v347_v30 = vld [vmem:[%s628_s4] ss:$0 sm:$0xff] }
  0x1c   :  { %414 = vmatprep.subr.bf16.mxu0 %v480_v1  ;;  %398 = vmatprep.subr.bf16.mxu1 %v480_v1  ;;  %v356_v38 = vld [vmem:[#allocation2] ss:$0 sm:$0xff] }
  0x1e   :  { %391 = vmatmul.mubr.msk.bf16.vlgmr.msra.gmra.mrb[0].mxu0 %vm66_vm1, %v42_v6 }
  0x1f   :  { %430 = vmatprep.mubr.msk.bf16.mxu0 %vm481_vm0, %v480_v1  ;;  %399 = vmatpush3.bf16.msra.mxu1 %v441_v8 }
  0x20   :  { %400 = vmatprep.subr.bf16.mxu1 %v480_v1  ;;  %415 = vmatpush3.bf16.msra.mxu0 %v447_v14 }
  0x21   :  { %416 = vmatprep.subr.bf16.mxu0 %v480_v1 }
  0x23   :  { %401 = vmatpush3.bf16.msra.mxu1 %v442_v9 }
  0x24   :  { %402 = vmatprep.subr.bf16.mxu1 %v480_v1  ;;  %417 = vmatpush3.bf16.msra.mxu0 %v448_v15 }
  0x25   :  { %418 = vmatprep.subr.bf16.mxu0 %v480_v1 }
  0x27   :  { %403 = vmatpush3.bf16.msra.mxu1 %v443_v10 }
  0x28   :  { %404 = vmatprep.subr.bf16.mxu1 %v480_v1  ;;  %419 = vmatpush3.bf16.msra.mxu0 %v449_v16 }
  0x29   :  { %420 = vmatprep.subr.bf16.mxu0 %v480_v1 }
  0x2b   :  { %405 = vmatpush3.bf16.msra.mxu1 %v444_v11 }
  0x2c   :  { %406 = vmatprep.subr.bf16.mxu1 %v480_v1  ;;  %421 = vmatpush3.bf16.msra.mxu0 %v450_v17 }
  0x2d   :  { %422 = vmatprep.subr.bf16.mxu0 %v480_v1 }
  0x2f   :  { %407 = vmatpush3.bf16.msra.mxu1 %v445_v12 }
  0x30   :  { %408 = vmatprep.subr.bf16.mxu1 %v480_v1  ;;  %423 = vmatpush3.bf16.msra.mxu0 %v451_v18 }
  0x31   :  { %424 = vmatprep.subr.bf16.mxu0 %v480_v1 }
  0x33   :  { %409 = vmatpush3.bf16.msra.mxu1 %v446_v13 }
  0x34   :  { %425 = vmatpush3.bf16.msra.mxu0 %v452_v19 }
  0x35   :  { %426 = vmatprep.subr.bf16.mxu0 %v480_v1 }
  0x38   :  { %427 = vmatpush3.bf16.msra.mxu0 %v453_v28 }
  0x39   :  { %428 = vmatprep.subr.bf16.mxu0 %v480_v1 }
  0x3c   :  { %429 = vmatpush3.bf16.msra.mxu0 %v454_v29 }
  0xf1   :  { %v104_v21 = vpop.f32.mrb[0].mxu0 }
  0xf2   :  { %v105_v22 = vadd.f32 %v343_v20, %v104_v21  ;;  %v392_v23 = vpop.f32.mrb[1].mxu0 }
  0xf3   :  { %v107_v24 = vpop.f32.mrb[2].mxu0 }
  0xf4   :  { %v110_v25 = vmax.f32 %v105_v22, 0.0  ;;  %v393_v26 = vpop.f32.mrb[3].mxu0 }
  0xf6   :  { %v111_v27 = vpack.c.bf16 %v110_v25, %v110_v25 }
  0xf8   :  { %411 = vmatmul.mubr.bf16.vlgmr.msra.gmra.mrb[0].mxu1 %v111_v27 }
 0x1cb   :  { %v217_v31 = vpop.f32.mrb[0].mxu1 }
 0x1cc   :  { %v218_v32 = vadd.f32 %v347_v30, %v217_v31  ;;  %v412_v33 = vpop.f32.mrb[1].mxu1 }
 0x1cd   :  { %v220_v34 = vpop.f32.mrb[2].mxu1 }
 0x1ce   :  { %v223_v35 = vmax.f32 %v218_v32, 0.0  ;;  %v413_v36 = vpop.f32.mrb[3].mxu1 }
 0x1d0   :  { %v224_v37 = vpack.c.bf16 %v223_v35, %v223_v35 }
 0x1d2   :  { %431 = vmatmul.mubr.bf16.vlgmr.msra.gmra.mrb[4].mxu0 %v224_v37 }
 0x2a5   :  { %v330_v39 = vpop.f32.mrb[4].mxu0 }
 0x2a6   :  { %v331_v40 = vadd.f32 %v356_v38, %v330_v39  ;;  %v432_v41 = vpop.f32.mrb[5].mxu0 }
 0x2a7   :  { %v333_v42 = vpop.f32.mrb[6].mxu0 }
 0x2a8   :  { %337 = vst.msk [vmem:[%s631_s7] sm:$0xff] %vm336_vm2, %v331_v40  ;;  %v433_v43 = vpop.f32.mrb[7].mxu0 }
 0x2a9   :  { %342 = vsyncpa [#allocation4], 1 }

</bundles_post_ra>
